<compile_context>
chip_gen: v7x
topology: tpu7x:2x2x1
jax: 0.10.0
libtpu: 0.0.40
codegen_flags: <defaults>
</compile_context>

<pallas_src>
from functools import partial

import jax
import jax.numpy as jnp
from jax.experimental import pallas as pl
from jax.experimental.pallas import tpu as pltpu


def _att_layer2_kernel(x_ref, w1_ref, b1_ref, w2_ref, o_ref, *, s_valid):
    # x_ref : (TB, SP, D) bf16 block of batch rows (SP = padded sequence length)
    # w1_ref: (D, D) bf16 (resident), b1_ref/w2_ref: (1, D) f32 (resident)
    # o_ref : (TB, D)
    TB, SP, D = x_ref.shape
    x = x_ref[...]                                               # (TB, SP, D) bf16

    # ---- Linear(D, D) + bias, Tanh: one big MXU matmul (bf16 in, f32 acc) ----
    h = jnp.tanh(
        jnp.dot(x.reshape(TB * SP, D), w1_ref[...],
                preferred_element_type=jnp.float32)
        + b1_ref[...]
    )                                                            # (TB*SP, D) f32

    # ---- Linear(D, 1), no bias: lane-axis reduce -> lane-dense (TB, SP) ----
    scores = jnp.sum(h.reshape(TB, SP, D) * w2_ref[...], axis=-1)  # (TB, SP) f32

    # ---- mask padded sequence positions (static) so they get zero weight ----
    if s_valid < SP:
        pos = jax.lax.broadcasted_iota(jnp.int32, (TB, SP), 1)
        scores = jnp.where(pos < s_valid, scores, -jnp.inf)

    # ---- softmax over the sequence axis (dim=1 of the original (B,S,1)) ----
    m = jnp.max(scores, axis=-1, keepdims=True)                  # (TB, 1)
    e = jnp.exp(scores - m)                                      # (TB, SP)
    denom = jnp.sum(e, axis=-1, keepdims=True)                   # (TB, 1)
    att = e * pl.reciprocal(denom, approx=True)                  # (TB, SP)

    # ---- weighted pooling over the sequence (bf16 x, f32 accumulate) ----
    out = jnp.sum(x * att[:, :, None], axis=1)                   # (TB, D) f32
    o_ref[...] = out.astype(o_ref.dtype)


def _pick_block_b(B, SP, D, block_b):
    # VMEM budget per batch row (bytes): double-buffered bf16 x (2*2), f32 h (4),
    # f32 pooling temp (4), slack (2).  Keep under ~40 MiB (v7x: 64 MiB / TC).
    per_row = SP * D * (2 * 2 + 4 + 4 + 2)
    budget = 40 * 1024 * 1024
    tb = min(block_b, max(8, budget // max(per_row, 1)))
    tb = max(8, (tb // 8) * 8)                  # sublane multiple
    b_ceil = max(8, ((B + 7) // 8) * 8)
    tb = min(tb, b_ceil)
    # Keep >= 2 grid steps when the batch allows (v7x megacore: 2 TCs).
    while tb > 8 and pl.cdiv(B, tb) < 2:
        tb -= 8
    return tb


def att_layer2(x, w1, b1, w2, *, block_b=128):
    """x: (B, S, D); w1: (D, D); b1: (1, D) or (D,); w2: (1, D) or (D,) -> (B, D)."""
    B, S, D = x.shape
    out_dtype = x.dtype

    # Parameters: tiny, kept resident across the grid (constant index_map).
    w1 = jnp.asarray(w1).astype(jnp.bfloat16)
    b1 = jnp.asarray(b1).reshape(1, D).astype(jnp.float32)
    w2 = jnp.asarray(w2).reshape(1, D).astype(jnp.float32)

    # Stream x in bf16; pad only the sequence axis to a sublane multiple so the
    # in-kernel reshapes are tile-aligned.  No batch padding (OOB rows of the
    # last partial block are handled by Pallas and never contaminate real rows).
    SP = ((S + 7) // 8) * 8
    xb = x.astype(jnp.bfloat16)
    if SP != S:
        xb = jnp.pad(xb, ((0, 0), (0, SP - S), (0, 0)))

    tb = _pick_block_b(B, SP, D, block_b)

    out = pl.pallas_call(
        partial(_att_layer2_kernel, s_valid=S),
        out_shape=jax.ShapeDtypeStruct((B, D), out_dtype),
        grid_spec=pltpu.PrefetchScalarGridSpec(
            num_scalar_prefetch=0,
            grid=(pl.cdiv(B, tb),),
            in_specs=[
                pl.BlockSpec((tb, SP, D), lambda b: (b, 0, 0)),  # x batch tile
                pl.BlockSpec((D, D), lambda b: (0, 0)),          # W1 (resident)
                pl.BlockSpec((1, D), lambda b: (0, 0)),          # b1 (resident)
                pl.BlockSpec((1, D), lambda b: (0, 0)),          # w2 (resident)
            ],
            out_specs=pl.BlockSpec((tb, D), lambda b: (b, 0)),
        ),
        compiler_params=pltpu.CompilerParams(
            dimension_semantics=("parallel",),
            vmem_limit_bytes=56 * 1024 * 1024,
        ),
    )(xb, w1, b1, w2)
    return out


def _reference(x, w1, b1, w2):
    # Plain-JAX f32 reference mirroring the PyTorch forward.
    h = jnp.tanh(jnp.einsum("bsd,de->bse", x, w1) + b1)             # (B, S, D)
    scores = jnp.einsum("bsd,d->bs", h, w2.reshape(-1))[..., None]  # (B, S, 1)
    att = jax.nn.softmax(scores, axis=1)                            # (B, S, 1)
    return jnp.sum(x * att, axis=1)                                 # (B, D)


if __name__ == "__main__":
    def run_case(B, S, D, key):
        kx, kw1, kb1, kw2 = jax.random.split(key, 4)
        bound = 1.0 / jnp.sqrt(jnp.float32(D))
        x = jax.random.normal(kx, (B, S, D), dtype=jnp.float32)
        w1 = jax.random.uniform(kw1, (D, D), minval=-bound, maxval=bound,
                                dtype=jnp.float32)
        b1 = jax.random.uniform(kb1, (1, D), minval=-bound, maxval=bound,
                                dtype=jnp.float32)
        w2 = jax.random.uniform(kw2, (1, D), minval=-bound, maxval=bound,
                                dtype=jnp.float32)

        out = jax.block_until_ready(att_layer2(x, w1, b1, w2))
        ref = _reference(x, w1, b1, w2)
        assert out.shape == (B, D)
        # bf16 x / W1 on the MXU + approx reciprocal -> loosened tolerance.
        err = float(jnp.max(jnp.abs(out - ref)))
        assert jnp.allclose(out, ref, atol=5e-2, rtol=5e-2), (
            f"mismatch (B={B}, S={S}, D={D}): max abs err {err}")

    key = jax.random.PRNGKey(0)
    k1, k2 = jax.random.split(key)
    run_case(16, 8, 32, k1)    # aligned batch & sequence
    run_case(10, 10, 32, k2)   # odd batch (partial last block) + padded sequence

    print("KERNEL_OK")
</pallas_src>

<mosaic_0001>
module attributes {stable_mosaic.version = 11 : i64} {
  func.func @_att_layer2_kernel(%arg0: i32, %arg1: memref<8x8x32xbf16, #tpu.memory_space<vmem>>, %arg2: memref<32x32xbf16, #tpu.memory_space<vmem>>, %arg3: memref<1x32xf32, #tpu.memory_space<vmem>>, %arg4: memref<1x32xf32, #tpu.memory_space<vmem>>, %arg5: memref<8x32xf32, #tpu.memory_space<vmem>>) attributes {dimension_semantics = [#tpu.dimension_semantics<parallel>], iteration_bounds = array<i64: 2>, scalar_prefetch = 0 : i64, scratch_operands = 0 : i64, tpu.core_type = #tpu.core_type<tc>, window_params = [{transform_indices = @transform_0, window_bounds = array<i64: 8, 8, 32>}, {pipeline_mode = #tpu.pipeline_mode<synchronous>, transform_indices = @transform_1, window_bounds = array<i64: 32, 32>}, {pipeline_mode = #tpu.pipeline_mode<synchronous>, transform_indices = @transform_2, window_bounds = array<i64: 1, 32>}, {pipeline_mode = #tpu.pipeline_mode<synchronous>, transform_indices = @transform_3, window_bounds = array<i64: 1, 32>}, {transform_indices = @transform_4, window_bounds = array<i64: 8, 32>}]} {
    %c0 = arith.constant 0 : index
    %c0_0 = arith.constant 0 : index
    %c0_1 = arith.constant 0 : index
    %0 = vector.load %arg1[%c0, %c0_0, %c0_1] : memref<8x8x32xbf16, #tpu.memory_space<vmem>>, vector<8x8x32xbf16>
    %1 = vector.shape_cast %0 : vector<8x8x32xbf16> to vector<64x32xbf16>
    %c0_2 = arith.constant 0 : index
    %c0_3 = arith.constant 0 : index
    %2 = vector.load %arg2[%c0_2, %c0_3] : memref<32x32xbf16, #tpu.memory_space<vmem>>, vector<32x32xbf16>
    %cst = arith.constant dense<0.000000e+00> : vector<64x32xf32>
    %3 = tpu.matmul %1, %2, %cst {dimension_numbers = #tpu.dot_dimension_numbers<[1], [0], [0], [1], [0, 0, 1, 1], [], []>} : vector<64x32xbf16>, vector<32x32xbf16>, vector<64x32xf32> -> vector<64x32xf32>
    %c0_4 = arith.constant 0 : index
    %c0_5 = arith.constant 0 : index
    %4 = vector.load %arg3[%c0_4, %c0_5] : memref<1x32xf32, #tpu.memory_space<vmem>>, vector<1x32xf32>
    %5 = vector.broadcast %4 : vector<1x32xf32> to vector<64x32xf32>
    %6 = arith.addf %3, %5 : vector<64x32xf32>
    %7 = math.tanh %6 : vector<64x32xf32>
    %8 = vector.shape_cast %7 : vector<64x32xf32> to vector<8x8x32xf32>
    %c0_6 = arith.constant 0 : index
    %c0_7 = arith.constant 0 : index
    %9 = vector.load %arg4[%c0_6, %c0_7] : memref<1x32xf32, #tpu.memory_space<vmem>>, vector<1x32xf32>
    %10 = vector.shape_cast %9 : vector<1x32xf32> to vector<1x1x32xf32>
    %11 = vector.broadcast %10 : vector<1x1x32xf32> to vector<8x8x32xf32>
    %12 = arith.mulf %8, %11 : vector<8x8x32xf32>
    %cst_8 = arith.constant dense<0.000000e+00> : vector<8x8xf32>
    %13 = vector.multi_reduction <add>, %12, %cst_8 [2] : vector<8x8x32xf32> to vector<8x8xf32>
    %cst_9 = arith.constant dense<0xFF800000> : vector<8xf32>
    %14 = vector.multi_reduction <maximumf>, %13, %cst_9 [1] : vector<8x8xf32> to vector<8xf32>
    %15 = vector.shape_cast %14 : vector<8xf32> to vector<8x1xf32>
    %16 = vector.broadcast %15 : vector<8x1xf32> to vector<8x8xf32>
    %17 = arith.subf %13, %16 : vector<8x8xf32>
    %18 = math.exp %17 : vector<8x8xf32>
    %cst_10 = arith.constant dense<0.000000e+00> : vector<8xf32>
    %19 = vector.multi_reduction <add>, %18, %cst_10 [1] : vector<8x8xf32> to vector<8xf32>
    %20 = vector.shape_cast %19 : vector<8xf32> to vector<8x1xf32>
    %21 = tpu.reciprocal %20 {approx = true} : vector<8x1xf32> -> vector<8x1xf32>
    %22 = vector.broadcast %21 : vector<8x1xf32> to vector<8x8xf32>
    %23 = arith.mulf %18, %22 : vector<8x8xf32>
    %24 = vector.shape_cast %23 : vector<8x8xf32> to vector<8x8x1xf32>
    %25 = arith.extf %0 : vector<8x8x32xbf16> to vector<8x8x32xf32>
    %26 = vector.broadcast %24 : vector<8x8x1xf32> to vector<8x8x32xf32>
    %27 = arith.mulf %25, %26 : vector<8x8x32xf32>
    %cst_11 = arith.constant dense<0.000000e+00> : vector<8x32xf32>
    %28 = vector.multi_reduction <add>, %27, %cst_11 [1] : vector<8x8x32xf32> to vector<8x32xf32>
    %c0_12 = arith.constant 0 : index
    %c0_13 = arith.constant 0 : index
    %29 = vector.load %arg5[%c0_12, %c0_13] : memref<8x32xf32, #tpu.memory_space<vmem>>, vector<8x32xf32>
    tpu.vector_store %arg5[%c0_12, %c0_13], %28 {strides = array<i32>} : memref<8x32xf32, #tpu.memory_space<vmem>>, vector<8x32xf32>,
    return
  }
  func.func @transform_0(%arg0: i32) -> (i32, i32, i32) {
    %c0_i32 = arith.constant 0 : i32
    %c0_i32_0 = arith.constant 0 : i32
    %c0_i32_1 = arith.constant 0 : i32
    return %arg0, %c0_i32, %c0_i32_0 : i32, i32, i32
  }
  func.func @transform_1(%arg0: i32) -> (i32, i32) {
    %c0_i32 = arith.constant 0 : i32
    %c0_i32_0 = arith.constant 0 : i32
    %c0_i32_1 = arith.constant 0 : i32
    return %c0_i32, %c0_i32_0 : i32, i32
  }
  func.func @transform_2(%arg0: i32) -> (i32, i32) {
    %c0_i32 = arith.constant 0 : i32
    %c0_i32_0 = arith.constant 0 : i32
    %c0_i32_1 = arith.constant 0 : i32
    return %c0_i32, %c0_i32_0 : i32, i32
  }
  func.func @transform_3(%arg0: i32) -> (i32, i32) {
    %c0_i32 = arith.constant 0 : i32
    %c0_i32_0 = arith.constant 0 : i32
    %c0_i32_1 = arith.constant 0 : i32
    return %c0_i32, %c0_i32_0 : i32, i32
  }
  func.func @transform_4(%arg0: i32) -> (i32, i32) {
    %c0_i32 = arith.constant 0 : i32
    %c0_i32_0 = arith.constant 0 : i32
    return %arg0, %c0_i32 : i32, i32
  }
}

</mosaic_0001>

<bundles_post_ra>
// kernel: tpu_custom_call.1
= control target key start
LH: loop header
LB: loop body
LE: loop exit
PB: predicated region body
PF: predicated region fallthrough
CT: control target
= control target key end

     0   :  { %9 = vsyncpa [#allocation3], 0  ;;  %s1541_s0 = inlined_call_operand.hbm [shape: bf16[16,8,32], index: 0, kind: input, shape index: {}]   ;;  %s1542_s1 = inlined_call_operand.hbm [shape: bf16[32,32], index: 1, kind: input, shape index: {}]   ;;  %s1543_s2 = inlined_call_operand.vmem [shape: f32[1,32], index: 2, kind: input, shape index: {}]   ;;  %s1544_s3 = inlined_call_operand.vmem [shape: f32[1,32], index: 3, kind: input, shape index: {}]   ;;  %s1545_s4 = inlined_call_operand.hbm [shape: f32[16,32], index: 4, kind: output, shape index: {}]  }
   0x1   :  { %11 = vsyncpa [#allocation3 + $0x1], 0 }
   0x2   :  { %12 = vsyncpa [#allocation6], 0 }
   0x3   :  { %13 = vsyncpa [#allocation4], 0 }
   0x4   :  { %15 = vsyncpa [#allocation4 + $0x1], 0  ;;  %s1200_s15 = smov 0   ;;  %s1202_s16 = smov 0  }
   0x5   :  { %s1204_s17 = smov 0   ;;  %s1206_s18 = smov 0  }
   0x6 LB: > { %s1221_s19 = sadd.s32 4294967295, %s1167_s18   ;;  %s883_s20 = sadd.s32 4294967294, %s1167_s18   ;;  %s1167_s18 = sphi %s1206_s18, %s1565_s18   ;;  %s1163_s17 = sphi %s1204_s17, %s1564_s17   ;;  %s1159_s16 = sphi %s1202_s16, %s1563_s16   ;;  %s1155_s15 = sphi %s1200_s15, %s1562_s15  }
   0x7   : > { %p41_p0 = scmp.ne.s32.totalorder %s1159_s16, %s1155_s15  ;;  %p1546_p1 = scmp.eq.s32.totalorder %s1221_s19, 0 }
   0x8   : > { %p134_p3 = scmp.eq.s32.totalorder %s883_s20, 1  ;;  %p884_p5 = scmp.ge.s32.totalorder %s1167_s18, 1 }
   0x9   : > { %p1230_p4 = por %p1546_p1, %p41_p0  ;;  %p141_p7 = scmp.lt.s32.totalorder %s1167_s18, 3 }
   0xa   : > { %p1235_p6 = por %p134_p3, %p41_p0  ;;  %s1169_s24 = smov [#allocation5]  }
   0xb   : > { %s1549_s21 = scalar_select %p1230_p4, 1, 0 }
   0xc   : > { %s1550_s22 = scalar_select %p1235_p6, 1, 0 }
   0xd   : > { %p1240_p8 = pnand %p884_p5, %p141_p7  ;;  %s153_s25 = sshll.u32 %s1169_s24, 4  ;;  %s1244_s25 = int_to_ptr.vmem [resolvable:$true] %s153_s25 }
   0xe   : > { %s1256_s27 = sadd.s32 1, %s1167_s18   ;;  %s28_s28 = sadd.s32 1, %s1163_s17 }
   0xf   : > { %s1551_s23 = scalar_select %p1240_p8, 1, 0 }
  0x10   : > { %p941_p9 = pneg %p1240_p8  ;;  %s25_s29 = ssub.s32 %s1167_s18, %s1256_s27 }
  0x11   : > { %s1039_s6 = scalar_lea.hbm %s1542_s1, 256 }
  0x12   : > { %p1251_p11 = pnand %p941_p9, %p1546_p1  ;;  %p1040_p12 = scmp.ne.s32.totalorder %s1542_s1, %s1039_s6 }
  0x13   : > { %p1046_p5 = scmp.lt.u32.totalorder %s1039_s6, %s1542_s1 }
  0x14   : > { %p1041_p13 = pneg %p1251_p11 }
  0x16   : > { %p1042_p0 = pnand %p1041_p13, %p1040_p12 }
  0x18   : > { %p1043_p3 = pneg %p1042_p0 }
  0x1a   : > { %p1048_p7 = pnand %p1046_p5, %p1043_p3 }
  0x1c   : > { %1051 = shalt.err (!%p1048_p7)
}
  0x1d   : > { %s1052_s11 = scalar_lea.vmem %s1244_s25, 256  ;;  %p1060_p2 = scmp.lt.s32.totalorder %s1244_s25, %s1244_s25 }
  0x1e   : > { %p1053_p9 = scmp.ne.s32.totalorder %s1244_s25, %s1052_s11  ;;  %p1061_p6 = scmp.lt.s32.totalorder %s1052_s11, %s1052_s11 }
  0x20   : > { %p1055_p10 = pnand %p1053_p9, %p1041_p13  ;;  %p1062_p4 = por %p1061_p6, %p1060_p2 }
  0x22   : > { %p1056_p1 = pneg %p1055_p10 }
  0x24   : > { %p1063_p8 = pnand %p1062_p4, %p1056_p1 }
  0x26   : > { %1066 = shalt.err (!%p1063_p8)
}
  0x27   : > { %s1170_s12 = smov 64   ;;  %s1171_s13 = smov 4  }
  0x28   : > { %944 = dma.hbm_to_vmem [thread:$0]  (!%p1251_p11), %s1542_s1, 256, %s1244_s25, [#allocation6], %s1170_s12, %s1170_s12, %s1171_s13  }
  0x29   : > { %p26_p1 = scmp.eq.s32.totalorder %s25_s29, 0  ;;  %p35_p2 = scmp.ne.s32.totalorder %s1163_s17, %s1159_s16 }
  0x2a   : > { %p36_p4 = scmp.eq.s32.totalorder %s1167_s18, 0  ;;  %p954_p6 = scmp.lt.s32.totalorder %s1167_s18, 2 }
  0x2b   : > { %s1290_s24 = scalar_select %p26_p1, %s1163_s17, %s28_s28  }
  0x2c   : > { %p37_p8 = por %p36_p4, %p35_p2  ;;  %p1553_p10 = scmp.eq.s32.totalorder %s1221_s19, 1 }
  0x2d   : > { %s173_s26 = sand.u32 1, %s1163_s17   ;;  %s910_s5 = sshll.u32 %s1167_s18, 9 }
  0x2e   : > { %p1294_p12 = por %p1553_p10, %p35_p2  ;;  %s887_s6 = sshll.u32 %s173_s26, 5 }
  0x2f   : > { %s1303_s9 = scalar_lea.hbm %s1541_s0, %s910_s5  ;;  %s177_s25 = scalar_lea.vmem [#allocation2], %s887_s6 }
  0x30   : > { %s184_s28 = sshll.u32 %s177_s25, 4  ;;  %p1305_p11 = pnand %p954_p6, %p37_p8  ;;  %s1309_s28 = int_to_ptr.vmem [resolvable:$true] %s184_s28 }
  0x31   : > { %s1311_s10 = scalar_lea.sflag [#allocation3], %s173_s26  ;;  %s1067_s11 = scalar_lea.hbm %s1303_s9, 512 }
  0x32   : > { %p1068_p13 = scmp.ne.s32.totalorder %s1303_s9, %s1067_s11  ;;  %p1069_p0 = pneg %p1305_p11 }
  0x33   : > { %s1072_s5 = scalar_lea.hbm %s1541_s0, 1024  ;;  %p1073_p7 = scmp.lt.u32.totalorder %s1303_s9, %s1541_s0 }
  0x34   : > { %p1070_p3 = pnand %p1069_p0, %p1068_p13  ;;  %p1074_p9 = scmp.lt.u32.totalorder %s1072_s5, %s1067_s11 }
  0x35   : > { %p1076_p2 = scmp.lt.u32.totalorder %s1067_s11, %s1303_s9 }
  0x36   : > { %p1071_p5 = pneg %p1070_p3  ;;  %p1075_p1 = por %p1074_p9, %p1073_p7 }
  0x38   : > { %p1077_p4 = por %p1076_p2, %p1075_p1 }
  0x3a   : > { %p1078_p6 = pnand %p1077_p4, %p1071_p5 }
  0x3c   : > { %1081 = shalt.err (!%p1078_p6)
}
  0x3d   : > { %s1082_s26 = scalar_lea.vmem %s1309_s28, 512  ;;  %s1172_s8 = smov [#allocation2]  }
  0x3e   : > { %p1083_p8 = scmp.ne.s32.totalorder %s1309_s28, %s1082_s26  ;;  %s1087_s25 = sshll.u32 %s1172_s8, 4  ;;  %s1088_s25 = int_to_ptr.vmem [resolvable:$false] %s1087_s25 }
  0x3f   : > { %s1089_s14 = scalar_lea.vmem %s1088_s25, 1024  ;;  %p1090_p3 = scmp.lt.s32.totalorder %s1309_s28, %s1088_s25 }
  0x40   : > { %p1085_p10 = pnand %p1083_p8, %p1069_p0  ;;  %p1091_p7 = scmp.lt.s32.totalorder %s1089_s14, %s1082_s26 }
  0x42   : > { %p1086_p13 = pneg %p1085_p10  ;;  %p1092_p9 = por %p1091_p7, %p1090_p3 }
  0x44   : > { %p1093_p1 = pnand %p1092_p9, %p1086_p13 }
  0x46   : > { %1096 = shalt.err (!%p1093_p1)
}
  0x47   : > { %948 = dma.hbm_to_vmem [thread:$0]  (!%p1305_p11), %s1303_s9, 512, %s1309_s28, %s1311_s10, %s1170_s12, %s1170_s12, %s1171_s13  }
  0x48   : > { %p1556_p0 = scmp.ne.s32.totalorder %s1551_s23, 0 }
  0x49   : > { %s1345_s11 = sand.u32 (!%p1556_p0), 1, %s1159_s16   ;;  %p1557_p5 = scmp.ne.s32.totalorder (!%p1556_p0), %s1549_s21, 0 }
  0x4a   : > { %196 = sbr.rel (%p1556_p0) target bundleno = 1140 (0x474), region = 36  ;;  %s891_s20 = sshll.u32 (!%p1556_p0), %s1345_s11, 5 }
  0x4b   : > { %s199_s5 = scalar_lea.sflag (!%p1556_p0), [#allocation3], %s1345_s11  ;;  %s202_s6 = scalar_lea.vmem (!%p1556_p0), [#allocation2], %s891_s20 }
  0x51   : > { %1142 = dma.done.wait (%p1557_p5), %s199_s5, 512  }
  0x52   : > { %1144 = vsyncadd (%p1557_p5), %s199_s5, 4294966784  ;;  %p1558_p2 = scmp.eq.s32.totalorder %s1221_s19, 0 }
  0x54   : > { %1146 = dma.done.wait (%p1558_p2), [#allocation6], 256   ;;  %p1559_p11 = pmov %p1558_p2 }
  0x55   : > { %v995_v0 = vld [vmem:[#allocation5] sm:$0xff]   ;;  %v996_v1 = vld [vmem:[#allocation5 + $0x8] sm:$0xff]   ;;  %vm284_vm0 = vcmask 261120   ;;  %v1359_v3 = vld [vmem:[%s202_s6 + $0x10] sm:$0xff]   ;;  %v417_v48 = vlaneseq  ;;  %vm451_vm1 = vcmask 1041409   ;;  %vm453_vm2 = vcmask 1042434  }
  0x56   : > { %1148 = vsyncadd (%p1559_p11), [#allocation6], 4294967040  ;;  %917 = vmatprep.subr.bf16.mxu0 %v995_v0  ;;  %929 = vmatprep.subr.bf16.mxu1 %v995_v0  ;;  %v1357_v2 = vld [vmem:[%s202_s6] sm:$0xff]   ;;  %v1361_v4 = vld [vmem:[%s202_s6 + $0x8] sm:$0xff]   ;;  %vm455_vm3 = vcmask 1043459   ;;  %vm457_vm4 = vcmask 1044484  }
  0x57   : > { %918 = vmatpush3.bf16.msra.mxu0 %v995_v0  ;;  %931 = vmatpush3.bf16.msra.mxu1 %v995_v0  ;;  %v1363_v5 = vld [vmem:[%s202_s6 + $0x18] sm:$0xff]   ;;  %v894_v6 = vld [vmem:[%s1543_s2] ss:$0 sm:$0xff]  ;;  %v418_v49 = vand.u32 127, %v417_v48  ;;  %v1387_v50 = vshrl.u32 %v417_v48, 7  ;;  %vm459_vm5 = vcmask 1045509  }
  0x58   : > { %919 = vmatprep.subr.bf16.mxu0 %v996_v1  ;;  %930 = vmatprep.subr.bf16.mxu1 %v996_v1  ;;  %v905_v23 = vld [vmem:[%s1544_s3] ss:$0 sm:$0xff]  ;;  %vm461_vm6 = vcmask 1046534   ;;  %vm463_vm7 = vcmask 1047559   ;;  %vm466_vm8 = vcmask 64512   ;;  %s893_s9 = sshll.u32 %s1345_s11, 3 }
  0x59   : > { %921 = vmatprep.mubr.msk.bf16.mxu0 %vm284_vm0, %v1357_v2  ;;  %925 = vmatprep.mubr.msk.bf16.mxu1 %vm284_vm0, %v1359_v3  ;;  %v1390_v53 = vsub.s32 %v418_v49, %v1387_v50  ;;  %s907_s28 = sshll.u32 %s1221_s19, 7  ;;  %s230_s29 = scalar_lea.vmem [#allocation7], %s893_s9 }
  0x5a   : > { %s803_s10 = sshll.u32 %s230_s29, 4  ;;  %s1495_s8 = scalar_lea.hbm %s1545_s4, %s907_s28  ;;  %s1497_s10 = int_to_ptr.vmem [resolvable:$true] %s803_s10 }
  0x5b   : > { %920 = vmatpush3.bf16.msra.mxu0 %v996_v1  ;;  %932 = vmatpush3.bf16.msra.mxu1 %v996_v1  ;;  %s790_s19 = scalar_lea.sflag [#allocation4], %s1345_s11  ;;  %s1097_s25 = scalar_lea.vmem %s1497_s10, 128 }
  0x5c   : > { %p1098_p4 = scmp.ne.s32.totalorder %s1497_s10, %s1097_s25  ;;  %s1174_s14 = smov [#allocation7]  }
  0x5d   : > { %s1101_s20 = sshll.u32 %s1174_s14, 4  ;;  %s1102_s20 = int_to_ptr.vmem [resolvable:$false] %s1101_s20 }
  0x5e   : > { %922 = vmatmul.mubr.msk.bf16.vlgmr.msra.gmra.mrb[0].mxu0 %vm284_vm0, %v1361_v4  ;;  %926 = vmatmul.mubr.msk.bf16.vlgmr.msra.gmra.mrb[0].mxu1 %vm284_vm0, %v1363_v5  ;;  %p1099_p6 = pnand %p1098_p4, %p1294_p12  ;;  %s1103_s5 = scalar_lea.vmem %s1102_s20, 256 }
  0x5f   : > { %p1104_p10 = scmp.lt.s32.totalorder %s1497_s10, %s1102_s20  ;;  %p1105_p13 = scmp.lt.s32.totalorder %s1103_s5, %s1097_s25 }
  0x60   : > { %p1100_p8 = pneg %p1099_p6 }
  0x61   : > { %p1106_p3 = por %p1105_p13, %p1104_p10 }
  0x63   : > { %p1107_p7 = pnand %p1106_p3, %p1100_p8 }
 0x131   : > { %v923_v7 = vpop.f32.mrb[0].mxu0  ;;  %v927_v8 = vpop.f32.mrb[0].mxu1 }
 0x132   : > { %v340_v9 = vadd.f32 %v923_v7, %v894_v6  ;;  %v331_v10 = vpop.f32.mrb[1].mxu0  ;;  %v347_v11 = vpop.f32.mrb[1].mxu1  ;;  %v356_v22 = vadd.f32 %v927_v8, %v894_v6 }
 0x133   : > { %v332_v12 = vadd.f32 %v894_v6, %v331_v10  ;;  %v924_v13 = vpop.f32.mrb[2].mxu0  ;;  %v928_v14 = vpop.f32.mrb[2].mxu1  ;;  %v348_v19 = vadd.f32 %v894_v6, %v347_v11 }
 0x134   : > { %1005 = vtanh.f32 %v340_v9  ;;  %v343_v15 = vadd.f32 %v924_v13, %v894_v6  ;;  %v334_v16 = vpop.f32.mrb[3].mxu0  ;;  %v350_v17 = vpop.f32.mrb[3].mxu1  ;;  %v359_v21 = vadd.f32 %v928_v14, %v894_v6 }
 0x135   : > { %1007 = vtanh.f32 %v332_v12  ;;  %v335_v18 = vadd.f32 %v894_v6, %v334_v16  ;;  %v351_v20 = vadd.f32 %v894_v6, %v350_v17  ;;  %v1173_v16 = vmov 0  }
 0x136   : > { %1009 = vtanh.f32 %v343_v15  ;;  %994 = vset.pattern.permute.xlu0 %v1173_v16  ;;  %993 = vset.pattern.permute.xlu1 %v1173_v16  ;;  %v473_v17 = vsub.s32 0, %v1387_v50 }
 0x137   : > { %1011 = vtanh.f32 %v335_v18  ;;  %v477_v18 = vsub.s32 1, %v1387_v50 }
 0x138   : > { %1013 = vtanh.f32 %v348_v19  ;;  %v481_v19 = vsub.s32 2, %v1387_v50 }
 0x139   : > { %1015 = vtanh.f32 %v351_v20  ;;  %v485_v20 = vsub.s32 3, %v1387_v50 }
 0x13a   : > { %1017 = vtanh.f32 %v359_v21 }
 0x13b   : > { %1019 = vtanh.f32 %v356_v22 }
 0x13e   : > { %v1006_v24 = vpop.eup %1005 }
 0x13f   : > { %v1008_v25 = vpop.eup %1007  ;;  %v379_v26 = vmul.f32 %v1006_v24, %v905_v23 }
 0x140   : > { %v1010_v27 = vpop.eup %1009  ;;  %v377_v28 = vmul.f32 %v1008_v25, %v905_v23  ;;  %v489_v25 = vsub.s32 4, %v1387_v50 }
 0x141   : > { %v1012_v29 = vpop.eup %1011  ;;  %v391_v30 = vsel %vm284_vm0, %v379_v26, 0.0  ;;  %v380_v31 = vmul.f32 %v1010_v27, %v905_v23 }
 0x142   : > { %392 = vadd.xlane.f32.xlu1 %v391_v30  ;;  %v385_v32 = vsel %vm284_vm0, %v377_v28, 0.0  ;;  %v378_v33 = vmul.f32 %v1012_v29, %v905_v23  ;;  %v1014_v34 = vpop.eup %1013 }
 0x143   : > { %386 = vadd.xlane.f32.xlu0 %v385_v32  ;;  %v1016_v35 = vpop.eup %1015  ;;  %v394_v36 = vsel %vm284_vm0, %v380_v31, 0.0  ;;  %v381_v40 = vmul.f32 %v1014_v34, %v905_v23  ;;  %v493_v32 = vsub.s32 5, %v1387_v50 }
 0x144   : > { %v1018_v37 = vpop.eup %1017  ;;  %v388_v38 = vsel %vm284_vm0, %v378_v33, 0.0  ;;  %v382_v39 = vmul.f32 %v1016_v35, %v905_v23 }
 0x145   : > { %v1020_v41 = vpop.eup %1019  ;;  %v384_v43 = vmul.f32 %v1018_v37, %v905_v23  ;;  %v397_v44 = vsel %vm284_vm0, %v381_v40, 0.0  ;;  %v501_v40 = vsub.s32 7, %v1387_v50 }
 0x146   : > { %395 = vadd.xlane.f32.xlu1 %v394_v36  ;;  %v400_v42 = vsel %vm284_vm0, %v382_v39, 0.0  ;;  %v383_v45 = vmul.f32 %v1020_v41, %v905_v23  ;;  %v497_v36 = vsub.s32 6, %v1387_v50 }
 0x147   : > { %389 = vadd.xlane.f32.xlu0 %v388_v38  ;;  %v406_v46 = vsel %vm284_vm0, %v384_v43, 0.0 }
 0x148   : > { %v403_v47 = vsel %vm284_vm0, %v383_v45, 0.0 }
 0x14a   : > { %401 = vadd.xlane.f32.xlu1 %v400_v42 }
 0x14b   : > { %398 = vadd.xlane.f32.xlu0 %v397_v44 }
 0x14e   : > { %407 = vadd.xlane.f32.xlu1 %v406_v46 }
 0x14f   : > { %404 = vadd.xlane.f32.xlu0 %v403_v47 }
 0x1cf   : > { %v393_v51 = vpop.xlane.xlu1 %392 }
 0x1d0   : > { %v387_v52 = vpop.xlane.xlu0 %386  ;;  %v430_v58 = vrot.slane %v393_v51, %v1390_v53 }
 0x1d1   : > { %v422_v56 = vrot.slane %v387_v52, %v1390_v53 }
 0x1d3   : > { %v396_v54 = vpop.xlane.xlu1 %395 }
 0x1d4   : > { %v390_v55 = vpop.xlane.xlu0 %389  ;;  %v434_v59 = vrot.slane %v396_v54, %v1390_v53 }
 0x1d5   : > { %v426_v57 = vrot.slane %v390_v55, %v1390_v53 }
 0x1d7   : > { %v452_v60 = vsel %vm451_vm1, %v426_v57, %v422_v56  ;;  %v402_v61 = vpop.xlane.xlu1 %401 }
 0x1d8   : > { %v454_v62 = vsel %vm453_vm2, %v430_v58, %v452_v60  ;;  %v399_v63 = vpop.xlane.xlu0 %398  ;;  %v442_v8 = vrot.slane %v402_v61, %v1390_v53 }
 0x1d9   : > { %v456_v0 = vsel %vm455_vm3, %v434_v59, %v454_v62  ;;  %v438_v1 = vrot.slane %v399_v63, %v1390_v53 }
 0x1db   : > { %v458_v6 = vsel %vm457_vm4, %v438_v1, %v456_v0  ;;  %v1401_v7 = vpop.xlane.xlu1 %407 }
 0x1dc   : > { %v405_v9 = vpop.xlane.xlu0 %404  ;;  %v450_v11 = vrot.slane %v1401_v7, %v1390_v53  ;;  %v460_v12 = vsel %vm459_vm5, %v442_v8, %v458_v6 }
 0x1dd   : > { %v446_v10 = vrot.slane %v405_v9, %v1390_v53 }
 0x1df   : > { %v462_v13 = vsel %vm461_vm6, %v446_v10, %v460_v12 }
 0x1e0   : > { %v464_v14 = vsel %vm463_vm7, %v450_v11, %v462_v13 }
 0x1e1   : > { %v467_v15 = vsel %vm466_vm8, %v464_v14, -inf }
 0x1e2   : > { %468 = vmax.xlane.f32.xlu0 %v467_v15 }
 0x26f   : > { %v469_v21 = vpop.xlane.xlu0 %468 }
 0x270   : > { %v474_v22 = vrot.slane %v469_v21, %v473_v17  ;;  %v478_v23 = vrot.slane %v469_v21, %v477_v18  ;;  %v482_v24 = vrot.slane %v469_v21, %v481_v19  ;;  %v486_v26 = vrot.slane %v469_v21, %v485_v20 }
 0x271   : > { %v490_v33 = vrot.slane %v469_v21, %v489_v25  ;;  %v494_v37 = vrot.slane %v469_v21, %v493_v32  ;;  %v498_v41 = vrot.slane %v469_v21, %v497_v36  ;;  %v502_v46 = vrot.slane %v469_v21, %v501_v40 }
 0x272   : > { %v511_v27 = vsub.f32 %v387_v52, %v474_v22  ;;  %v512_v28 = vsub.f32 %v390_v55, %v478_v23  ;;  %v513_v29 = vsub.f32 %v393_v51, %v482_v24  ;;  %v514_v34 = vsub.f32 %v396_v54, %v486_v26 }
 0x273   : > { %v515_v38 = vsub.f32 %v399_v63, %v490_v33  ;;  %v516_v42 = vsub.f32 %v402_v61, %v494_v37  ;;  %v517_v47 = vsub.f32 %v405_v9, %v498_v41  ;;  %v518_v51 = vsub.f32 %v1401_v7, %v502_v46 }
 0x274   : > { %v519_v30 = vmul.f32 1.442695, %v511_v27  ;;  %v521_v31 = vmul.f32 1.442695, %v512_v28  ;;  %v523_v35 = vmul.f32 1.442695, %v513_v29 }
 0x275   : > { %v525_v39 = vmul.f32 1.442695, %v514_v34  ;;  %v527_v43 = vmul.f32 1.442695, %v515_v38  ;;  %v529_v48 = vmul.f32 1.442695, %v516_v42 }
 0x276   : > { %1021 = vpow2.f32 %v519_v30  ;;  %v531_v52 = vmul.f32 1.442695, %v517_v47  ;;  %v533_v55 = vmul.f32 1.442695, %v518_v51  ;;  %v660_v47 = vunpack.c.l.bf16 %v1357_v2 }
 0x277   : > { %1023 = vpow2.f32 %v521_v31 }
 0x278   : > { %1025 = vpow2.f32 %v523_v35 }
 0x279   : > { %1027 = vpow2.f32 %v525_v39 }
 0x27a   : > { %1029 = vpow2.f32 %v527_v43 }
 0x27b   : > { %1031 = vpow2.f32 %v529_v48 }
 0x27c   : > { %1033 = vpow2.f32 %v531_v52  ;;  %v663_v52 = vunpack.c.h.bf16 %v1361_v4 }
 0x27d   : > { %1035 = vpow2.f32 %v533_v55 }
 0x280   : > { %v1022_v44 = vpop.eup %1021 }
 0x281   : > { %v1024_v45 = vpop.eup %1023  ;;  %544 = vperm.xlu1 %993, %v1022_v44  }
 0x282   : > { %547 = vperm.xlu0 %994, %v1024_v45   ;;  %v1026_v49 = vpop.eup %1025 }
 0x283   : > { %v1028_v54 = vpop.eup %1027 }
 0x284   : > { %v1030_v56 = vpop.eup %1029 }
 0x285   : > { %550 = vperm.xlu1 %993, %v1026_v49   ;;  %v1032_v57 = vpop.eup %1031 }
 0x286   : > { %v1034_v58 = vpop.eup %1033 }
 0x287   : > { %v1036_v59 = vpop.eup %1035 }
 0x289   : > { %553 = vperm.xlu1 %993, %v1028_v54  }
 0x28d   : > { %556 = vperm.xlu1 %993, %v1030_v56  }
 0x291   : > { %559 = vperm.xlu1 %993, %v1032_v57  }
 0x295   : > { %562 = vperm.xlu1 %993, %v1034_v58  }
 0x299   : > { %565 = vperm.xlu1 %993, %v1036_v59  }
 0x300   : > { %v545_v60 = vpop.permute.xlu1 %544 }
 0x301   : > { %v548_v0 = vpop.permute.xlu0 %547  ;;  %v570_v7 = vrot.slane %v545_v60, %v1390_v53 }
 0x302   : > { %v574_v6 = vrot.slane %v548_v0, %v1390_v53 }
 0x304   : > { %v551_v61 = vpop.permute.xlu1 %550  ;;  %v599_v12 = vsel %vm451_vm1, %v574_v6, %v570_v7 }
 0x305   : > { %v578_v8 = vrot.slane %v551_v61, %v1390_v53 }
 0x307   : > { %v600_v14 = vsel %vm453_vm2, %v578_v8, %v599_v12  ;;  %v666_v12 = vunpack.c.l.bf16 %v1363_v5 }
 0x308   : > { %v554_v62 = vpop.permute.xlu1 %553 }
 0x309   : > { %v582_v9 = vrot.slane %v554_v62, %v1390_v53 }
 0x30b   : > { %v601_v16 = vsel %vm455_vm3, %v582_v9, %v600_v14 }
 0x30c   : > { %v557_v63 = vpop.permute.xlu1 %556 }
 0x30d   : > { %v586_v10 = vrot.slane %v557_v63, %v1390_v53 }
 0x30f   : > { %v602_v21 = vsel %vm457_vm4, %v586_v10, %v601_v16 }
 0x310   : > { %v560_v1 = vpop.permute.xlu1 %559 }
 0x311   : > { %v590_v13 = vrot.slane %v560_v1, %v1390_v53 }
 0x313   : > { %v603_v23 = vsel %vm459_vm5, %v590_v13, %v602_v21 }
 0x314   : > { %v563_v11 = vpop.permute.xlu1 %562 }
 0x315   : > { %v594_v15 = vrot.slane %v563_v11, %v1390_v53 }
 0x317   : > { %v604_v26 = vsel %vm461_vm6, %v594_v15, %v603_v23 }
 0x318   : > { %v566_v22 = vpop.permute.xlu1 %565 }
 0x319   : > { %v598_v24 = vrot.slane %v566_v22, %v1390_v53 }
 0x31b   : > { %v605_v27 = vsel %vm463_vm7, %v598_v24, %v604_v26 }
 0x31c   : > { %v607_v28 = vsel %vm466_vm8, %v605_v27, 0.0  ;;  %v667_v27 = vunpack.c.h.bf16 %v1363_v5 }
 0x31d   : > { %608 = vadd.xlane.f32.xlu1 %v607_v28 }
 0x3aa   : > { %v609_v29 = vpop.xlane.xlu1 %608 }
 0x3ab   : > { %1037 = vrcp.f32 %v609_v29 }
 0x3b5   : > { %v1038_v30 = vpop.eup %1037 }
 0x3b6   : > { %v615_v31 = vrot.slane %v1038_v30, %v473_v17  ;;  %v619_v34 = vrot.slane %v1038_v30, %v477_v18  ;;  %v623_v53 = vrot.slane %v1038_v30, %v481_v19  ;;  %v627_v38 = vrot.slane %v1038_v30, %v485_v20 }
 0x3b7   : > { %v631_v41 = vrot.slane %v1038_v30, %v489_v25  ;;  %v635_v18 = vrot.slane %v1038_v30, %v493_v32  ;;  %v639_v19 = vrot.slane %v1038_v30, %v497_v36  ;;  %v643_v20 = vrot.slane %v1038_v30, %v501_v40 }
 0x3b8   : > { %v652_v33 = vmul.f32 %v1022_v44, %v615_v31  ;;  %v653_v35 = vmul.f32 %v1024_v45, %v619_v34  ;;  %v654_v37 = vmul.f32 %v1026_v49, %v623_v53  ;;  %v655_v39 = vmul.f32 %v1028_v54, %v627_v38 }
 0x3b9   : > { %v656_v17 = vmul.f32 %v1030_v56, %v631_v41  ;;  %v657_v42 = vmul.f32 %v1032_v57, %v635_v18  ;;  %v658_v43 = vmul.f32 %v1034_v58, %v639_v19  ;;  %v659_v44 = vmul.f32 %v1036_v59, %v643_v20 }
 0x3ba   : > { %670 = vperm.xlu0 %994, %v652_v33   ;;  %v661_v25 = vunpack.c.h.bf16 %v1357_v2  ;;  %v662_v32 = vunpack.c.l.bf16 %v1361_v4  ;;  %v664_v57 = vunpack.c.l.bf16 %v1359_v3  ;;  %v665_v4 = vunpack.c.h.bf16 %v1359_v3 }
 0x3be   : > { %675 = vperm.xlu0 %994, %v653_v35  }
 0x3c2   : > { %680 = vperm.xlu0 %994, %v654_v37  }
 0x3c6   : > { %685 = vperm.xlu0 %994, %v655_v39  }
 0x3ca   : > { %690 = vperm.xlu0 %994, %v656_v17  }
 0x3ce   : > { %695 = vperm.xlu0 %994, %v657_v42  }
 0x3d2   : > { %700 = vperm.xlu0 %994, %v658_v43  }
 0x3d6   : > { %705 = vperm.xlu0 %994, %v659_v44  }
 0x439   : > { %v671_v45 = vpop.permute.xlu0 %670 }
 0x43a   : > { %v708_v51 = vmul.f32 %v671_v45, %v660_v47 }
 0x43c   : > { %v716_v55 = vsel %vm284_vm0, %v708_v51, 0.0 }
 0x43d   : > { %v676_v46 = vpop.permute.xlu0 %675  ;;  %v717_v60 = vrot.slane %v716_v55, 4 }
 0x43e   : > { %v709_v48 = vmul.f32 %v676_v46, %v661_v25 }
 0x43f   : > { %v718_v7 = vadd.f32 %v717_v60, %v716_v55 }
 0x440   : > { %v723_v50 = vsel %vm284_vm0, %v709_v48, 0.0 }
 0x441   : > { %v681_v49 = vpop.permute.xlu0 %680  ;;  %v724_v58 = vrot.slane %v723_v50, 4  ;;  %v719_v21 = vrot.slane %v718_v7, 2 }
 0x442   : > { %v710_v36 = vmul.f32 %v681_v49, %v662_v32 }
 0x443   : > { %v725_v0 = vadd.f32 %v724_v58, %v723_v50  ;;  %v720_v33 = vadd.f32 %v719_v21, %v718_v7 }
 0x444   : > { %v730_v40 = vsel %vm284_vm0, %v710_v36, 0.0 }
 0x445   : > { %v686_v54 = vpop.permute.xlu0 %685  ;;  %v731_v2 = vrot.slane %v730_v40, 4  ;;  %v726_v13 = vrot.slane %v725_v0, 2  ;;  %v721_v5 = vrot.slane %v720_v33, 1 }
 0x446   : > { %v711_v56 = vmul.f32 %v686_v54, %v663_v52 }
 0x447   : > { %v732_v1 = vadd.f32 %v731_v2, %v730_v40  ;;  %v727_v28 = vadd.f32 %v726_v13, %v725_v0  ;;  %v722_v49 = vadd.f32 %v721_v5, %v720_v33 }
 0x448   : > { %v737_v59 = vsel %vm284_vm0, %v711_v56, 0.0 }
 0x449   : > { %v738_v61 = vrot.slane %v737_v59, 4  ;;  %v691_v62 = vpop.permute.xlu0 %690  ;;  %v733_v15 = vrot.slane %v732_v1, 2  ;;  %v728_v41 = vrot.slane %v727_v28, 1 }
 0x44a   : > { %v712_v63 = vmul.f32 %v691_v62, %v664_v57 }
 0x44b   : > { %v739_v8 = vadd.f32 %v738_v61, %v737_v59  ;;  %v734_v30 = vadd.f32 %v733_v15, %v732_v1  ;;  %v729_v25 = vadd.f32 %v728_v41, %v727_v28 }
 0x44c   : > { %v744_v6 = vsel %vm284_vm0, %v712_v63, 0.0 }
 0x44d   : > { %v745_v9 = vrot.slane %v744_v6, 4  ;;  %v696_v10 = vpop.permute.xlu0 %695  ;;  %v740_v22 = vrot.slane %v739_v8, 2  ;;  %v735_v42 = vrot.slane %v734_v30, 1  ;;  %v780_v40 = vsel %vm451_vm1, %v729_v25, %v722_v49 }
 0x44e   : > { %v713_v11 = vmul.f32 %v696_v10, %v665_v4 }
 0x44f   : > { %v746_v14 = vadd.f32 %v745_v9, %v744_v6  ;;  %v741_v34 = vadd.f32 %v740_v22, %v739_v8  ;;  %v736_v48 = vadd.f32 %v735_v42, %v734_v30 }
 0x450   : > { %v751_v16 = vsel %vm284_vm0, %v713_v11, 0.0 }
 0x451   : > { %v752_v23 = vrot.slane %v751_v16, 4  ;;  %v701_v3 = vpop.permute.xlu0 %700  ;;  %v747_v24 = vrot.slane %v746_v14, 2  ;;  %v742_v43 = vrot.slane %v741_v34, 1  ;;  %v781_v56 = vsel %vm453_vm2, %v736_v48, %v780_v40 }
 0x452   : > { %v714_v26 = vmul.f32 %v701_v3, %v666_v12 }
 0x453   : > { %v753_v29 = vadd.f32 %v752_v23, %v751_v16  ;;  %v748_v38 = vadd.f32 %v747_v24, %v746_v14  ;;  %v743_v51 = vadd.f32 %v742_v43, %v741_v34 }
 0x454   : > { %v758_v31 = vsel %vm284_vm0, %v714_v26, 0.0 }
 0x455   : > { %v754_v35 = vrot.slane %v753_v29, 2  ;;  %v759_v53 = vrot.slane %v758_v31, 4  ;;  %v706_v37 = vpop.permute.xlu0 %705  ;;  %v749_v45 = vrot.slane %v748_v38, 1  ;;  %v782_v58 = vsel %vm455_vm3, %v743_v51, %v781_v56 }
 0x456   : > { %v715_v39 = vmul.f32 %v706_v37, %v667_v27 }
 0x457   : > { %v755_v17 = vadd.f32 %v754_v35, %v753_v29  ;;  %v760_v18 = vadd.f32 %v759_v53, %v758_v31  ;;  %v750_v50 = vadd.f32 %v749_v45, %v748_v38 }
 0x458   : > { %v765_v19 = vsel %vm284_vm0, %v715_v39, 0.0 }
 0x459   : > { %v761_v20 = vrot.slane %v760_v18, 2  ;;  %v766_v44 = vrot.slane %v765_v19, 4  ;;  %v756_v46 = vrot.slane %v755_v17, 1  ;;  %v783_v59 = vsel %vm457_vm4, %v750_v50, %v782_v58 }
 0x45b   : > { %v762_v47 = vadd.f32 %v761_v20, %v760_v18  ;;  %v767_v32 = vadd.f32 %v766_v44, %v765_v19  ;;  %v757_v54 = vadd.f32 %v756_v46, %v755_v17 }
 0x45d   : > { %v763_v36 = vrot.slane %v762_v47, 1  ;;  %v768_v52 = vrot.slane %v767_v32, 2  ;;  %v784_v60 = vsel %vm459_vm5, %v757_v54, %v783_v59 }
 0x45f   : > { %v769_v55 = vadd.f32 %v768_v52, %v767_v32  ;;  %v764_v57 = vadd.f32 %v763_v36, %v762_v47 }
 0x461   : > { %v770_v2 = vrot.slane %v769_v55, 1  ;;  %v785_v62 = vsel %vm461_vm6, %v764_v57, %v784_v60 }
 0x463   : > { %v771_v61 = vadd.f32 %v770_v2, %v769_v55 }
 0x465   : > { %v786_v63 = vsel %vm463_vm7, %v771_v61, %v785_v62 }
 0x466   : > { %788 = vst.msk [vmem:[%s230_s29] sm:$0xff] %vm284_vm0, %v786_v63 }
 0x467   : > { %1110 = shalt.err (!%p1107_p7)
}
 0x468   : > { %s1111_s11 = scalar_lea.hbm %s1495_s8, 128  ;;  %s1115_s23 = scalar_lea.hbm %s1545_s4, 256 }
 0x469   : > { %p1112_p9 = scmp.ne.s32.totalorder %s1495_s8, %s1111_s11  ;;  %p1116_p5 = scmp.lt.u32.totalorder %s1495_s8, %s1545_s4 }
 0x46a   : > { %p1117_p2 = scmp.lt.u32.totalorder %s1115_s23, %s1111_s11  ;;  %p1119_p4 = scmp.lt.u32.totalorder %s1111_s11, %s1495_s8 }
 0x46b   : > { %p1113_p1 = pnand %p1112_p9, %p1294_p12 }
 0x46c   : > { %p1118_p11 = por %p1117_p2, %p1116_p5 }
 0x46d   : > { %p1114_p0 = pneg %p1113_p1 }
 0x46e   : > { %p1120_p6 = por %p1119_p4, %p1118_p11 }
 0x470   : > { %p1121_p8 = pnand %p1120_p6, %p1114_p0 }
 0x472   : > { %1124 = shalt.err (!%p1121_p8)
}
 0x473   : > { %939 = dma.vmem_to_hbm [thread:$0]  (%p1294_p12), %s1497_s10, 128, %s1495_s8, %s790_s19  }
 0x474 PF: > { %s815_s9 = sand.u32 1, %s1155_s15   ;;  %p1560_p10 = scmp.ne.s32.totalorder %s1550_s22, 0 }
 0x475   : > { %p1561_p13 = scmp.ge.s32.totalorder %s1167_s18, 2  ;;  %s816_s28 = scalar_lea.sflag [#allocation4], %s815_s9 }
 0x477   : > { %p950_p3 = pnand %p1561_p13, %p1560_p10 }
 0x479   : > { %1150 = dma.done.wait (!%p950_p3), %s816_s28, 128  }
 0x47a   : > { %1152 = vsyncadd (!%p950_p3), %s816_s28, 4294967168  ;;  %p18_p7 = scmp.ge.s32.totalorder %s1256_s27, 4   ;;  %s1562_s15 = smov %s1159_s16 }
 0x47b   : > { %s1563_s16 = smov %s1163_s17  ;;  %s1564_s17 = smov %s1290_s24 }
 0x47c   : > { %s1565_s18 = smov %s1256_s27  ;;  %20 = sbr.rel (!%p18_p7) target bundleno = 6 (0x6), region = 85 }
 0x483   :  { %821 = vsyncpa [#allocation3], 1 }
 0x484   :  { %823 = vsyncpa [#allocation3 + $0x1], 1 }
 0x485   :  { %824 = vsyncpa [#allocation6], 1 }
 0x486   :  { %825 = vsyncpa [#allocation4], 1 }
 0x487   :  { %827 = vsyncpa [#allocation4 + $0x1], 1 }

</bundles_post_ra>
